<compile_context>
chip_gen: v7x
topology: tpu7x:2x2x1
jax: 0.10.0
libtpu: 0.0.40
codegen_flags: <defaults>
</compile_context>

<pallas_src>
import functools

import jax
import jax.numpy as jnp
from jax.experimental import pallas as pl
from jax.experimental.pallas import tpu as pltpu


def _round_up(a, b):
    return (a + b - 1) // b * b


def _vmem_capacity_bytes():
    try:
        return int(pltpu.get_tpu_info().vmem_capacity_bytes)
    except Exception:
        return 64 * 1024 * 1024  # conservative default (v7x per-core VMEM)


def _vmem_limit_bytes(est_bytes, cap):
    # Enough for our buffers (+ headroom), never more than ~90% of physical VMEM.
    return int(max(32 << 20, min(est_bytes + (16 << 20), int(0.9 * cap))))


# ----------------------------- fused single-call path ------------------------------------------

def _fused_linear_bn_relu_kernel(inv_m, eps,
                                 x_ref, w_ref, gamma_ref, beta_ref, o_ref,
                                 y_slab, sum_ref, sumsq_ref, scale_ref, bias_ref):
    phase = pl.program_id(0)
    i = pl.program_id(1)
    tm = x_ref.shape[0]

    @pl.when(phase == 0)
    def _matmul_and_stats():
        @pl.when(i == 0)
        def _():
            sum_ref[...] = jnp.zeros_like(sum_ref)
            sumsq_ref[...] = jnp.zeros_like(sumsq_ref)

        # Linear (no bias): x[tm,K] @ weight[N,K]^T on the MXU (transposed-RHS contraction,
        # so the wrapper never materializes weight.T in HBM).
        y = jax.lax.dot_general(
            x_ref[...], w_ref[...],
            dimension_numbers=(((1,), (1,)), ((), ())),
            preferred_element_type=jnp.float32)
        y_slab[pl.ds(i * tm, tm), :] = y            # keep y resident in VMEM

        # Per-channel sum / sum-of-squares on the MXU (ones @ y); direct slice accumulates.
        ones = jnp.ones((1, tm), dtype=jnp.float32)
        sum_ref[...] += jnp.dot(ones, y, preferred_element_type=jnp.float32)
        sumsq_ref[...] += jnp.dot(ones, y * y, preferred_element_type=jnp.float32)

    @pl.when(phase == 1)
    def _bn_relu():
        @pl.when(i == 0)
        def _fold_bn_once():
            mean = sum_ref[...] * inv_m
            var = jnp.maximum(sumsq_ref[...] * inv_m - mean * mean, 0.0)   # biased variance
            inv_std = jax.lax.rsqrt(var + eps)
            scale = gamma_ref[...] * inv_std
            scale_ref[...] = scale
            bias_ref[...] = beta_ref[...] - mean * scale

        y = y_slab[pl.ds(i * tm, tm), :]
        o_ref[...] = jnp.maximum(y * scale_ref[...] + bias_ref[...], 0.0).astype(o_ref.dtype)


# ----------------------------- two-pass fallback path ------------------------------------------

def _matmul_stats_kernel(x_ref, w_ref, y_ref, stats_ref, sum_ref, sumsq_ref):
    i = pl.program_id(0)

    @pl.when(i == 0)
    def _():
        sum_ref[...] = jnp.zeros_like(sum_ref)
        sumsq_ref[...] = jnp.zeros_like(sumsq_ref)

    y = jax.lax.dot_general(
        x_ref[...], w_ref[...],
        dimension_numbers=(((1,), (1,)), ((), ())),
        preferred_element_type=jnp.float32)
    y_ref[...] = y

    ones = jnp.ones((1, y.shape[0]), dtype=jnp.float32)
    sum_ref[...] += jnp.dot(ones, y, preferred_element_type=jnp.float32)
    sumsq_ref[...] += jnp.dot(ones, y * y, preferred_element_type=jnp.float32)

    # Write the (2, N) stats output once, at the last grid step (no per-step masked stores).
    @pl.when(i == pl.num_programs(0) - 1)
    def _():
        stats_ref[0:1, :] = sum_ref[...]
        stats_ref[1:2, :] = sumsq_ref[...]


def _scale_bias_relu_kernel(y_ref, scale_ref, bias_ref, o_ref):
    o_ref[...] = jnp.maximum(
        y_ref[...] * scale_ref[...] + bias_ref[...], 0.0).astype(o_ref.dtype)


# ----------------------------- wrapper ----------------------------------------------------------

def single_linear_layer(x, weight, gamma, beta, eps=1e-5, block_m=512,
                        use_bf16_matmul=False, two_pass=None):
    """x: [B, fan_in]. weight: [fan_out, fan_in]. gamma/beta: [fan_out]. Returns [B, fan_out] f32."""
    m, k = x.shape
    n = weight.shape[0]
    assert weight.shape[1] == k

    # Lane-dense padding (K, N -> multiples of 128); batch tiled by tm (multiple of 8).
    k_pad = _round_up(k, 128)
    n_pad = _round_up(n, 128)
    tm = _round_up(min(block_m, _round_up(m, 8)), 8)
    m_pad = _round_up(m, tm)
    num_tiles = m_pad // tm

    # Optional bf16 MXU inputs (accuracy trade-off); stats/BN math stays f32 either way.
    in_dtype = jnp.bfloat16 if use_bf16_matmul else jnp.float32
    itemsize_in = jnp.dtype(in_dtype).itemsize

    x_p = jnp.pad(x.astype(jnp.float32), ((0, m_pad - m), (0, k_pad - k))).astype(in_dtype)
    w_p = jnp.pad(weight.astype(jnp.float32),
                  ((0, n_pad - n), (0, k_pad - k))).astype(in_dtype)          # native [N, K]
    g_p = jnp.pad(gamma.astype(jnp.float32).reshape(1, n), ((0, 0), (0, n_pad - n)))
    b_p = jnp.pad(beta.astype(jnp.float32).reshape(1, n), ((0, 0), (0, n_pad - n)))

    cap = _vmem_capacity_bytes()

    # Decide fused vs fallback based on the VMEM footprint of the y slab + pipeline buffers.
    slab_bytes = m_pad * n_pad * 4
    fused_bytes = (slab_bytes
                   + 2 * tm * k_pad * itemsize_in      # x tiles (double-buffered)
                   + 2 * n_pad * k_pad * itemsize_in   # resident weight (2 bufs, conservative)
                   + 2 * tm * n_pad * 4                # output tiles (double-buffered)
                   + 8 * 8 * n_pad * 4)                # gamma/beta bufs + small scratches
    use_fused = fused_bytes <= int(0.7 * cap)
    if two_pass is True:
        use_fused = False
    elif two_pass is False:
        use_fused = True

    if use_fused:
        out_p = pl.pallas_call(
            functools.partial(_fused_linear_bn_relu_kernel, 1.0 / m, float(eps)),
            out_shape=jax.ShapeDtypeStruct((m_pad, n_pad), jnp.float32),
            grid=(2, num_tiles),
            in_specs=[
                # phase 0: walk the batch tiles; phase 1: hold the last tile (no re-fetch of x).
                pl.BlockSpec((tm, k_pad),
                             lambda p, i: ((1 - p) * i + p * (num_tiles - 1), 0)),
                pl.BlockSpec((n_pad, k_pad), lambda p, i: (0, 0)),   # weight resident
                pl.BlockSpec((1, n_pad), lambda p, i: (0, 0)),       # gamma resident
                pl.BlockSpec((1, n_pad), lambda p, i: (0, 0)),       # beta resident
            ],
            # phase 0: output block pinned at 0 (never written back);
            # phase 1: one lane-dense store per batch tile.
            out_specs=pl.BlockSpec((tm, n_pad), lambda p, i: (p * i, 0)),
            scratch_shapes=[
                pltpu.VMEM((m_pad, n_pad), jnp.float32),   # y slab (no HBM round trip)
                pltpu.VMEM((1, n_pad), jnp.float32),       # per-channel sum
                pltpu.VMEM((1, n_pad), jnp.float32),       # per-channel sum of squares
                pltpu.VMEM((1, n_pad), jnp.float32),       # folded BN scale
                pltpu.VMEM((1, n_pad), jnp.float32),       # folded BN bias
            ],
            compiler_params=pltpu.CompilerParams(
                dimension_semantics=("arbitrary", "arbitrary"),
                vmem_limit_bytes=_vmem_limit_bytes(fused_bytes, cap)),
        )(x_p, w_p, g_p, b_p)
        return out_p[:m, :n]

    # ---- fallback pass 1: tiled matmul + per-channel stats (written once at the last step) ----
    pass1_bytes = (2 * tm * k_pad * itemsize_in + 2 * n_pad * k_pad * itemsize_in
                   + 2 * tm * n_pad * 4 + 8 * 8 * n_pad * 4)
    y, stats = pl.pallas_call(
        _matmul_stats_kernel,
        out_shape=(jax.ShapeDtypeStruct((m_pad, n_pad), jnp.float32),
                   jax.ShapeDtypeStruct((2, n_pad), jnp.float32)),
        grid=(num_tiles,),
        in_specs=[
            pl.BlockSpec((tm, k_pad), lambda i: (i, 0)),
            pl.BlockSpec((n_pad, k_pad), lambda i: (0, 0)),
        ],
        out_specs=(
            pl.BlockSpec((tm, n_pad), lambda i: (i, 0)),
            pl.BlockSpec((2, n_pad), lambda i: (0, 0)),
        ),
        scratch_shapes=[pltpu.VMEM((1, n_pad), jnp.float32),
                        pltpu.VMEM((1, n_pad), jnp.float32)],
        compiler_params=pltpu.CompilerParams(
            dimension_semantics=("arbitrary",),
            vmem_limit_bytes=_vmem_limit_bytes(pass1_bytes, cap)),
    )(x_p, w_p)

    # Fold BN into a single per-channel scale/bias outside the kernel (tiny 2xN computation),
    # so the per-tile body of pass 2 is just y*scale + bias + ReLU.
    mean = stats[0:1, :] * (1.0 / m)
    var = jnp.maximum(stats[1:2, :] * (1.0 / m) - mean * mean, 0.0)
    inv_std = jax.lax.rsqrt(var + eps)
    scale = g_p * inv_std
    bias = b_p - mean * scale

    # ---- fallback pass 2: folded affine + ReLU, parallel over batch tiles, in place of y ----
    pass2_bytes = 4 * tm * n_pad * 4 + 4 * 8 * n_pad * 4
    out_p = pl.pallas_call(
        _scale_bias_relu_kernel,
        out_shape=jax.ShapeDtypeStruct((m_pad, n_pad), jnp.float32),
        grid=(num_tiles,),
        in_specs=[
            pl.BlockSpec((tm, n_pad), lambda i: (i, 0)),
            pl.BlockSpec((1, n_pad), lambda i: (0, 0)),
            pl.BlockSpec((1, n_pad), lambda i: (0, 0)),
        ],
        out_specs=pl.BlockSpec((tm, n_pad), lambda i: (i, 0)),
        input_output_aliases={0: 0},   # reuse y's buffer for the output
        compiler_params=pltpu.CompilerParams(
            dimension_semantics=("parallel",),
            vmem_limit_bytes=_vmem_limit_bytes(pass2_bytes, cap)),
    )(y, scale, bias)

    return out_p[:m, :n]


def _reference(x, weight, gamma, beta, eps=1e-5):
    """Pure-JAX reference matching torch Linear(bias=False)+BatchNorm1d(train)+ReLU."""
    y = x @ weight.T
    mean = jnp.mean(y, axis=0, keepdims=True)
    var = jnp.mean((y - mean) ** 2, axis=0, keepdims=True)     # biased variance (train mode)
    y = (y - mean) * jax.lax.rsqrt(var + eps)
    y = y * gamma.reshape(1, -1) + beta.reshape(1, -1)
    return jnp.maximum(y, 0.0)


if __name__ == "__main__":
    # SingleLinearLayer(l=1, fan_in=32, fan_out=48, batch_norm=1e-5), batch=16
    B, FAN_IN, FAN_OUT = 16, 32, 48
    key = jax.random.PRNGKey(0)
    kx, kw, kg, kb = jax.random.split(key, 4)

    x = jax.random.normal(kx, (B, FAN_IN), dtype=jnp.float32)
    weight = jax.random.normal(kw, (FAN_OUT, FAN_IN), dtype=jnp.float32) * 0.1
    # BatchNorm1d default init is weight=1, bias=0; use non-trivial values to exercise the affine.
    gamma = 1.0 + 0.5 * jax.random.normal(kg, (FAN_OUT,), dtype=jnp.float32)
    beta = 0.1 * jax.random.normal(kb, (FAN_OUT,), dtype=jnp.float32)

    ref = jax.block_until_ready(_reference(x, weight, gamma, beta, eps=1e-5))

    # Primary fused path (auto-selected at this size).
    out_fused = jax.block_until_ready(single_linear_layer(x, weight, gamma, beta, eps=1e-5))
    assert out_fused.shape == (B, FAN_OUT)
    assert jnp.allclose(out_fused, ref, atol=1e-4, rtol=1e-4)

    # Two-pass fallback path (forced) — the path used when the y slab would not fit in VMEM.
    out_2p = jax.block_until_ready(
        single_linear_layer(x, weight, gamma, beta, eps=1e-5, two_pass=True))
    assert jnp.allclose(out_2p, ref, atol=1e-4, rtol=1e-4)

    print("KERNEL_OK")
</pallas_src>

<mosaic_0001>
module attributes {stable_mosaic.version = 11 : i64} {
  func.func @_fused_linear_bn_relu_kernel(%arg0: i32, %arg1: i32, %arg2: memref<16x128xf32, #tpu.memory_space<vmem>>, %arg3: memref<128x128xf32, #tpu.memory_space<vmem>>, %arg4: memref<1x128xf32, #tpu.memory_space<vmem>>, %arg5: memref<1x128xf32, #tpu.memory_space<vmem>>, %arg6: memref<16x128xf32, #tpu.memory_space<vmem>>, %arg7: memref<16x128xf32, #tpu.memory_space<vmem>>, %arg8: memref<1x128xf32, #tpu.memory_space<vmem>>, %arg9: memref<1x128xf32, #tpu.memory_space<vmem>>, %arg10: memref<1x128xf32, #tpu.memory_space<vmem>>, %arg11: memref<1x128xf32, #tpu.memory_space<vmem>>) attributes {dimension_semantics = [#tpu.dimension_semantics<arbitrary>, #tpu.dimension_semantics<arbitrary>], iteration_bounds = array<i64: 2, 1>, scalar_prefetch = 0 : i64, scratch_operands = 5 : i64, tpu.core_type = #tpu.core_type<tc>, window_params = [{transform_indices = @transform_0, window_bounds = array<i64: 16, 128>}, {pipeline_mode = #tpu.pipeline_mode<synchronous>, transform_indices = @transform_1, window_bounds = array<i64: 128, 128>}, {pipeline_mode = #tpu.pipeline_mode<synchronous>, transform_indices = @transform_2, window_bounds = array<i64: 1, 128>}, {pipeline_mode = #tpu.pipeline_mode<synchronous>, transform_indices = @transform_3, window_bounds = array<i64: 1, 128>}, {transform_indices = @transform_4, window_bounds = array<i64: 16, 128>}]} {
    %c0_i32 = arith.constant 0 : i32
    %0 = arith.cmpi eq, %arg0, %c0_i32 : i32
    %1 = arith.extui %0 : i1 to i32
    %c0_i32_0 = arith.constant 0 : i32
    %2 = arith.cmpi ne, %1, %c0_i32_0 : i32
    scf.if %2 {
      %c0_i32_2 = arith.constant 0 : i32
      %6 = arith.cmpi eq, %arg1, %c0_i32_2 : i32
      %7 = arith.extui %6 : i1 to i32
      %c0_i32_3 = arith.constant 0 : i32
      %8 = arith.cmpi ne, %7, %c0_i32_3 : i32
      scf.if %8 {
        %cst_19 = arith.constant 0.000000e+00 : f32
        %25 = vector.broadcast %cst_19 : f32 to vector<1x128xf32>
        %c0_20 = arith.constant 0 : index
        %c0_21 = arith.constant 0 : index
        %26 = vector.load %arg8[%c0_20, %c0_21] : memref<1x128xf32, #tpu.memory_space<vmem>>, vector<1x128xf32>
        tpu.vector_store %arg8[%c0_20, %c0_21], %25 {strides = array<i32>} : memref<1x128xf32, #tpu.memory_space<vmem>>, vector<1x128xf32>,
        %cst_22 = arith.constant 0.000000e+00 : f32
        %27 = vector.broadcast %cst_22 : f32 to vector<1x128xf32>
        %c0_23 = arith.constant 0 : index
        %c0_24 = arith.constant 0 : index
        %28 = vector.load %arg9[%c0_23, %c0_24] : memref<1x128xf32, #tpu.memory_space<vmem>>, vector<1x128xf32>
        tpu.vector_store %arg9[%c0_23, %c0_24], %27 {strides = array<i32>} : memref<1x128xf32, #tpu.memory_space<vmem>>, vector<1x128xf32>,
      } else {
      }
      %c0 = arith.constant 0 : index
      %c0_4 = arith.constant 0 : index
      %9 = vector.load %arg2[%c0, %c0_4] : memref<16x128xf32, #tpu.memory_space<vmem>>, vector<16x128xf32>
      %c0_5 = arith.constant 0 : index
      %c0_6 = arith.constant 0 : index
      %10 = vector.load %arg3[%c0_5, %c0_6] : memref<128x128xf32, #tpu.memory_space<vmem>>, vector<128x128xf32>
      %cst = arith.constant dense<0.000000e+00> : vector<16x128xf32>
      %11 = tpu.matmul %9, %10, %cst {dimension_numbers = #tpu.dot_dimension_numbers<[1], [1], [0], [0], [0, 0, 1, 0], [], []>} : vector<16x128xf32>, vector<128x128xf32>, vector<16x128xf32> -> vector<16x128xf32>
      %c16_i32 = arith.constant 16 : i32
      %12 = arith.muli %arg1, %c16_i32 : i32
      %13 = arith.index_cast %12 : i32 to index
      %c0_7 = arith.constant 0 : index
      %14 = vector.load %arg7[%13, %c0_7] : memref<16x128xf32, #tpu.memory_space<vmem>>, vector<16x128xf32>
      tpu.vector_store %arg7[%13, %c0_7], %11 {strides = array<i32>} : memref<16x128xf32, #tpu.memory_space<vmem>>, vector<16x128xf32>,
      %cst_8 = arith.constant 1.000000e+00 : f32
      %15 = vector.broadcast %cst_8 : f32 to vector<1x16xf32>
      %c0_9 = arith.constant 0 : index
      %c0_10 = arith.constant 0 : index
      %16 = vector.load %arg8[%c0_9, %c0_10] : memref<1x128xf32, #tpu.memory_space<vmem>>, vector<1x128xf32>
      %cst_11 = arith.constant dense<0.000000e+00> : vector<1x128xf32>
      %17 = tpu.matmul %15, %11, %cst_11 {dimension_numbers = #tpu.dot_dimension_numbers<[1], [0], [0], [1], [0, 0, 1, 1], [], []>} : vector<1x16xf32>, vector<16x128xf32>, vector<1x128xf32> -> vector<1x128xf32>
      %18 = arith.addf %16, %17 : vector<1x128xf32>
      %c0_12 = arith.constant 0 : index
      %c0_13 = arith.constant 0 : index
      %19 = vector.load %arg8[%c0_12, %c0_13] : memref<1x128xf32, #tpu.memory_space<vmem>>, vector<1x128xf32>
      tpu.vector_store %arg8[%c0_12, %c0_13], %18 {strides = array<i32>} : memref<1x128xf32, #tpu.memory_space<vmem>>, vector<1x128xf32>,
      %c0_14 = arith.constant 0 : index
      %c0_15 = arith.constant 0 : index
      %20 = vector.load %arg9[%c0_14, %c0_15] : memref<1x128xf32, #tpu.memory_space<vmem>>, vector<1x128xf32>
      %21 = arith.mulf %11, %11 : vector<16x128xf32>
      %cst_16 = arith.constant dense<0.000000e+00> : vector<1x128xf32>
      %22 = tpu.matmul %15, %21, %cst_16 {dimension_numbers = #tpu.dot_dimension_numbers<[1], [0], [0], [1], [0, 0, 1, 1], [], []>} : vector<1x16xf32>, vector<16x128xf32>, vector<1x128xf32> -> vector<1x128xf32>
      %23 = arith.addf %20, %22 : vector<1x128xf32>
      %c0_17 = arith.constant 0 : index
      %c0_18 = arith.constant 0 : index
      %24 = vector.load %arg9[%c0_17, %c0_18] : memref<1x128xf32, #tpu.memory_space<vmem>>, vector<1x128xf32>
      tpu.vector_store %arg9[%c0_17, %c0_18], %23 {strides = array<i32>} : memref<1x128xf32, #tpu.memory_space<vmem>>, vector<1x128xf32>,
    } else {
    }
    %c1_i32 = arith.constant 1 : i32
    %3 = arith.cmpi eq, %arg0, %c1_i32 : i32
    %4 = arith.extui %3 : i1 to i32
    %c0_i32_1 = arith.constant 0 : i32
    %5 = arith.cmpi ne, %4, %c0_i32_1 : i32
    scf.if %5 {
      %c0_i32_2 = arith.constant 0 : i32
      %6 = arith.cmpi eq, %arg1, %c0_i32_2 : i32
      %7 = arith.extui %6 : i1 to i32
      %c0_i32_3 = arith.constant 0 : i32
      %8 = arith.cmpi ne, %7, %c0_i32_3 : i32
      scf.if %8 {
        %c0_10 = arith.constant 0 : index
        %c0_11 = arith.constant 0 : index
        %21 = vector.load %arg8[%c0_10, %c0_11] : memref<1x128xf32, #tpu.memory_space<vmem>>, vector<1x128xf32>
        %cst_12 = arith.constant 6.250000e-02 : f32
        %22 = vector.broadcast %cst_12 : f32 to vector<1x128xf32>
        %23 = arith.mulf %21, %22 : vector<1x128xf32>
        %c0_13 = arith.constant 0 : index
        %c0_14 = arith.constant 0 : index
        %24 = vector.load %arg9[%c0_13, %c0_14] : memref<1x128xf32, #tpu.memory_space<vmem>>, vector<1x128xf32>
        %cst_15 = arith.constant 6.250000e-02 : f32
        %25 = vector.broadcast %cst_15 : f32 to vector<1x128xf32>
        %26 = arith.mulf %24, %25 : vector<1x128xf32>
        %27 = arith.mulf %23, %23 : vector<1x128xf32>
        %28 = arith.subf %26, %27 : vector<1x128xf32>
        %cst_16 = arith.constant 0.000000e+00 : f32
        %29 = vector.broadcast %cst_16 : f32 to vector<1x128xf32>
        %30 = arith.maximumf %28, %29 : vector<1x128xf32>
        %cst_17 = arith.constant 9.99999974E-6 : f32
        %31 = vector.broadcast %cst_17 : f32 to vector<1x128xf32>
        %32 = arith.addf %30, %31 : vector<1x128xf32>
        %33 = math.rsqrt %32 : vector<1x128xf32>
        %c0_18 = arith.constant 0 : index
        %c0_19 = arith.constant 0 : index
        %34 = vector.load %arg4[%c0_18, %c0_19] : memref<1x128xf32, #tpu.memory_space<vmem>>, vector<1x128xf32>
        %35 = arith.mulf %34, %33 : vector<1x128xf32>
        %c0_20 = arith.constant 0 : index
        %c0_21 = arith.constant 0 : index
        %36 = vector.load %arg10[%c0_20, %c0_21] : memref<1x128xf32, #tpu.memory_space<vmem>>, vector<1x128xf32>
        tpu.vector_store %arg10[%c0_20, %c0_21], %35 {strides = array<i32>} : memref<1x128xf32, #tpu.memory_space<vmem>>, vector<1x128xf32>,
        %c0_22 = arith.constant 0 : index
        %c0_23 = arith.constant 0 : index
        %37 = vector.load %arg5[%c0_22, %c0_23] : memref<1x128xf32, #tpu.memory_space<vmem>>, vector<1x128xf32>
        %38 = arith.mulf %23, %35 : vector<1x128xf32>
        %39 = arith.subf %37, %38 : vector<1x128xf32>
        %c0_24 = arith.constant 0 : index
        %c0_25 = arith.constant 0 : index
        %40 = vector.load %arg11[%c0_24, %c0_25] : memref<1x128xf32, #tpu.memory_space<vmem>>, vector<1x128xf32>
        tpu.vector_store %arg11[%c0_24, %c0_25], %39 {strides = array<i32>} : memref<1x128xf32, #tpu.memory_space<vmem>>, vector<1x128xf32>,
      } else {
      }
      %c16_i32 = arith.constant 16 : i32
      %9 = arith.muli %arg1, %c16_i32 : i32
      %10 = arith.index_cast %9 : i32 to index
      %c0 = arith.constant 0 : index
      %11 = vector.load %arg7[%10, %c0] : memref<16x128xf32, #tpu.memory_space<vmem>>, vector<16x128xf32>
      %c0_4 = arith.constant 0 : index
      %c0_5 = arith.constant 0 : index
      %12 = vector.load %arg10[%c0_4, %c0_5] : memref<1x128xf32, #tpu.memory_space<vmem>>, vector<1x128xf32>
      %13 = vector.broadcast %12 : vector<1x128xf32> to vector<16x128xf32>
      %14 = arith.mulf %11, %13 : vector<16x128xf32>
      %c0_6 = arith.constant 0 : index
      %c0_7 = arith.constant 0 : index
      %15 = vector.load %arg11[%c0_6, %c0_7] : memref<1x128xf32, #tpu.memory_space<vmem>>, vector<1x128xf32>
      %16 = vector.broadcast %15 : vector<1x128xf32> to vector<16x128xf32>
      %17 = arith.addf %14, %16 : vector<16x128xf32>
      %cst = arith.constant 0.000000e+00 : f32
      %18 = vector.broadcast %cst : f32 to vector<16x128xf32>
      %19 = arith.maximumf %17, %18 : vector<16x128xf32>
      %c0_8 = arith.constant 0 : index
      %c0_9 = arith.constant 0 : index
      %20 = vector.load %arg6[%c0_8, %c0_9] : memref<16x128xf32, #tpu.memory_space<vmem>>, vector<16x128xf32>
      tpu.vector_store %arg6[%c0_8, %c0_9], %19 {strides = array<i32>} : memref<16x128xf32, #tpu.memory_space<vmem>>, vector<16x128xf32>,
    } else {
    }
    return
  }
  func.func @transform_0(%arg0: i32, %arg1: i32) -> (i32, i32) {
    %c1_i32 = arith.constant 1 : i32
    %0 = arith.subi %c1_i32, %arg0 : i32
    %1 = arith.muli %0, %arg1 : i32
    %c0_i32 = arith.constant 0 : i32
    %2 = arith.muli %arg0, %c0_i32 : i32
    %3 = arith.addi %1, %2 : i32
    %c0_i32_0 = arith.constant 0 : i32
    %c0_i32_1 = arith.constant 0 : i32
    return %3, %c0_i32_0 : i32, i32
  }
  func.func @transform_1(%arg0: i32, %arg1: i32) -> (i32, i32) {
    %c0_i32 = arith.constant 0 : i32
    %c0_i32_0 = arith.constant 0 : i32
    %c0_i32_1 = arith.constant 0 : i32
    return %c0_i32, %c0_i32_0 : i32, i32
  }
  func.func @transform_2(%arg0: i32, %arg1: i32) -> (i32, i32) {
    %c0_i32 = arith.constant 0 : i32
    %c0_i32_0 = arith.constant 0 : i32
    %c0_i32_1 = arith.constant 0 : i32
    return %c0_i32, %c0_i32_0 : i32, i32
  }
  func.func @transform_3(%arg0: i32, %arg1: i32) -> (i32, i32) {
    %c0_i32 = arith.constant 0 : i32
    %c0_i32_0 = arith.constant 0 : i32
    %c0_i32_1 = arith.constant 0 : i32
    return %c0_i32, %c0_i32_0 : i32, i32
  }
  func.func @transform_4(%arg0: i32, %arg1: i32) -> (i32, i32) {
    %0 = arith.muli %arg0, %arg1 : i32
    %c0_i32 = arith.constant 0 : i32
    %c0_i32_0 = arith.constant 0 : i32
    return %0, %c0_i32 : i32, i32
  }
}

</mosaic_0001>

<bundles_post_ra>
// kernel: tpu_custom_call.1
= control target key start
LH: loop header
LB: loop body
LE: loop exit
PB: predicated region body
PF: predicated region fallthrough
CT: control target
= control target key end

     0   :  { %9 = vsyncpa [#allocation8], 0  ;;  %s1168_s0 = inlined_call_operand.hbm [shape: f32[16,128], index: 0, kind: input, shape index: {}]   ;;  %s1169_s1 = inlined_call_operand.hbm [shape: f32[128,128], index: 1, kind: input, shape index: {}]   ;;  %s1170_s2 = inlined_call_operand.vmem [shape: f32[1,128], index: 2, kind: input, shape index: {}]   ;;  %s1171_s3 = inlined_call_operand.vmem [shape: f32[1,128], index: 3, kind: input, shape index: {}]   ;;  %s1172_s4 = inlined_call_operand.hbm [shape: f32[16,128], index: 4, kind: output, shape index: {}]  }
   0x1   :  { %11 = vsyncpa [#allocation8 + $0x1], 0 }
   0x2   :  { %12 = vsyncpa [#allocation11], 0 }
   0x3   :  { %13 = vsyncpa [#allocation9], 0 }
   0x4   :  { %15 = vsyncpa [#allocation9 + $0x1], 0  ;;  %s1028_s15 = smov 0   ;;  %s1030_s16 = smov 0  }
   0x5   :  { %s1032_s17 = smov 0  }
   0x6 LB: > { %s675_s18 = sadd.s32 4294967295, %s990_s17   ;;  %s676_s19 = sadd.s32 4294967294, %s990_s17   ;;  %s990_s17 = sphi %s1032_s17, %s21_s17   ;;  %s986_s16 = sphi %s1030_s16, %s1187_s16   ;;  %s982_s15 = sphi %s1028_s15, %s1186_s15  }
   0x7   : > { %s33_s20 = sadd.s32 1, %s986_s16  ;;  %p677_p0 = scmp.ge.s32.totalorder %s990_s17, 1 }
   0x8   : > { %p35_p1 = scmp.ge.s32.totalorder %s33_s20, 2  ;;  %p159_p2 = scmp.lt.s32.totalorder %s990_s17, 3 }
   0x9   : > { %p1050_p3 = scmp.eq.s32.totalorder %s675_s18, 0  ;;  %s992_s23 = smov [#allocation10]  }
   0xa   : > { %s1189_s20 = smov (%p35_p1, %s33_s20), 0  ;;  %p1056_p4 = pnand %p677_p0, %p159_p2 }
   0xb   : > { %s1176_s21 = scalar_select %p1050_p3, 1, 0 }
   0xc   : > { %s1177_s22 = scalar_select %p1056_p4, 1, 0 }
   0xd   : > { %s171_s24 = sshll.u32 %s992_s23, 4  ;;  %p817_p5 = pneg %p1056_p4  ;;  %s172_s24 = int_to_ptr.vmem [resolvable:$true] %s171_s24 }
   0xe   : > { %s874_s28 = scalar_lea.hbm %s1169_s1, 2048 }
   0xf   : > { %p1065_p7 = pnand %p1050_p3, %p817_p5  ;;  %p875_p10 = scmp.ne.s32.totalorder %s1169_s1, %s874_s28 }
  0x10   : > { %p881_p0 = scmp.lt.u32.totalorder %s874_s28, %s1169_s1 }
  0x11   : > { %p876_p11 = pneg %p1065_p7 }
  0x13   : > { %p877_p12 = pnand %p876_p11, %p875_p10 }
  0x15   : > { %p878_p13 = pneg %p877_p12 }
  0x17   : > { %p883_p1 = pnand %p881_p0, %p878_p13 }
  0x19   : > { %886 = shalt.err (!%p883_p1)
}
  0x1a   : > { %s887_s7 = scalar_lea.vmem %s172_s24, 2048  ;;  %p895_p9 = scmp.lt.s32.totalorder %s172_s24, %s172_s24 }
  0x1b   : > { %p888_p2 = scmp.ne.s32.totalorder %s172_s24, %s887_s7  ;;  %p896_p8 = scmp.lt.s32.totalorder %s887_s7, %s887_s7 }
  0x1d   : > { %p890_p5 = pnand %p888_p2, %p876_p11  ;;  %p897_p3 = por %p896_p8, %p895_p9 }
  0x1f   : > { %p891_p6 = pneg %p890_p5 }
  0x21   : > { %p898_p4 = pnand %p897_p3, %p891_p6 }
  0x23   : > { %901 = shalt.err (!%p898_p4)
}
  0x24   : > { %s993_s8 = smov 128   ;;  %s994_s9 = smov 8  }
  0x25   : > { %820 = dma.hbm_to_vmem [thread:$0]  (!%p1065_p7), %s1169_s1, 2048, %s172_s24, [#allocation11], %s993_s8, %s993_s8, %s994_s9  }
  0x26   : > { %s995_s12 = smov [#allocation7]   ;;  %p1179_p10 = scmp.lt.s32.totalorder %s990_s17, 2 }
  0x27   : > { %s204_s13 = sshll.u32 %s995_s12, 4  ;;  %p1180_p11 = scmp.eq.s32.totalorder %s990_s17, 0  ;;  %s205_s13 = int_to_ptr.vmem [resolvable:$true] %s204_s13 }
  0x28   : > { %s902_s27 = scalar_lea.hbm %s1168_s0, 256 }
  0x29   : > { %p1091_p12 = pnand %p1180_p11, %p1179_p10  ;;  %p903_p3 = scmp.ne.s32.totalorder %s1168_s0, %s902_s27 }
  0x2a   : > { %p909_p8 = scmp.lt.u32.totalorder %s902_s27, %s1168_s0 }
  0x2b   : > { %p904_p4 = pneg %p1091_p12 }
  0x2d   : > { %p905_p6 = pnand %p904_p4, %p903_p3 }
  0x2f   : > { %p906_p7 = pneg %p905_p6 }
  0x31   : > { %p911_p9 = pnand %p909_p8, %p906_p7 }
  0x33   : > { %914 = shalt.err (!%p911_p9)
}
  0x34   : > { %s915_s30 = scalar_lea.vmem %s205_s13, 256  ;;  %s922_s5 = scalar_lea.vmem %s205_s13, 512 }
  0x35   : > { %p916_p13 = scmp.ne.s32.totalorder %s205_s13, %s915_s30  ;;  %p923_p2 = scmp.lt.s32.totalorder %s205_s13, %s205_s13 }
  0x36   : > { %p924_p5 = scmp.lt.s32.totalorder %s922_s5, %s915_s30 }
  0x37   : > { %p918_p0 = pnand %p916_p13, %p904_p4 }
  0x38   : > { %p925_p10 = por %p924_p5, %p923_p2 }
  0x39   : > { %p919_p1 = pneg %p918_p0 }
  0x3b   : > { %p926_p11 = pnand %p925_p10, %p919_p1 }
  0x3d   : > { %929 = shalt.err (!%p926_p11)
}
  0x3e   : > { %824 = dma.hbm_to_vmem [thread:$0]  (!%p1091_p12), %s1168_s0, 256, %s205_s13, [#allocation8], %s993_s8, %s993_s8, %s994_s9  }
  0x3f   : > { %p1182_p3 = scmp.ne.s32.totalorder %s1177_s22, 0 }
  0x40   : > { %p1183_p6 = scmp.ne.s32.totalorder (!%p1182_p3), %s1176_s21, 0 }
  0x41   : > { %216 = sbr.rel (%p1182_p3) target bundleno = 649 (0x289), region = 36 }
  0x48   : > { %969 = dma.done.wait (%p1183_p6), [#allocation8], 256  }
  0x49   : > { %971 = vsyncadd (%p1183_p6), [#allocation8], 4294967040 }
  0x4a   : > { %973 = dma.done.wait (%p1183_p6), [#allocation11], 2048  }
  0x4b   : > { %975 = vsyncadd (%p1183_p6), [#allocation11], 4294965248  ;;  %p684_p4 = scmp.ne.s32.totalorder %s982_s15, 0 }
  0x4c   : > { %v268_v0 = vld [vmem:[#allocation10] sm:$0xff] (!%p684_p4)  ;;  %v269_v1 = vld [vmem:[#allocation10 + $0x8] sm:$0xff] (!%p684_p4)  ;;  %v270_v2 = vld [vmem:[#allocation10 + $0x10] sm:$0xff] (!%p684_p4)  ;;  %v996_v26 = vmov (!%p684_p4), 0.0|0.0   ;;  %vm997_vm0 = vmmov (!%p684_p4), 0   ;;  %v998_v27 = vmov (!%p684_p4), 0.0  }
  0x4d   : > { %259 = sbr.rel (%p684_p4) target bundleno = 580 (0x244), region = 48  ;;  %v767_v3 = vpack.c.bf16 (!%p684_p4), %v269_v1, %v268_v0  ;;  %v271_v4 = vld [vmem:[#allocation10 + $0x18] sm:$0xff] (!%p684_p4)  ;;  %v266_v6 = vld [vmem:[#allocation7] sm:$0xff] (!%p684_p4)  ;;  %v273_v8 = vld [vmem:[#allocation10 + $0x28] sm:$0xff] (!%p684_p4)  ;;  %799 = vmatprep.subr.bf16.mxu1 (!%p684_p4), %v996_v26  ;;  %757 = vmatprep.mubr.msk.f32.mxu1 (!%p684_p4), %vm997_vm0, %v998_v27  ;;  %264 = vst [vmem:[#allocation3] sm:$0x1] (!%p684_p4), %v998_v27 }
  0x4e   : > { %v771_v5 = vpack.c.bf16 (!%p684_p4), %v271_v4, %v270_v2  ;;  %v272_v7 = vld [vmem:[#allocation10 + $0x20] sm:$0xff] (!%p684_p4)  ;;  %750 = vmatprep.mubr.f32.mxu0 (!%p684_p4), %v266_v6  ;;  %v274_v10 = vld [vmem:[#allocation10 + $0x30] sm:$0xff] (!%p684_p4)  ;;  %v275_v11 = vld [vmem:[#allocation10 + $0x38] sm:$0xff] (!%p684_p4)  ;;  %265 = vst [vmem:[#allocation4] sm:$0x1] (!%p684_p4), %v998_v27  ;;  %vm364_vm1 = vcmask (!%p684_p4), 130048  }
  0x4f   : > { %768 = vmatprep.subr.bf16.mxu0 (!%p684_p4), %v767_v3  ;;  %v775_v9 = vpack.c.bf16 (!%p684_p4), %v273_v8, %v272_v7  ;;  %v779_v12 = vpack.c.bf16 (!%p684_p4), %v275_v11, %v274_v10  ;;  %v276_v13 = vld [vmem:[#allocation10 + $0x40] sm:$0xff] (!%p684_p4)  ;;  %v277_v14 = vld [vmem:[#allocation10 + $0x48] sm:$0xff] (!%p684_p4)  ;;  %v278_v16 = vld [vmem:[#allocation10 + $0x50] sm:$0xff] (!%p684_p4)  ;;  %v999_v34 = vmov (!%p684_p4), 1.0  }
  0x50   : > { %770 = vmatpush3.bf16.xpose.msra.mxu0 (!%p684_p4), %v767_v3  ;;  %v783_v15 = vpack.c.bf16 (!%p684_p4), %v277_v14, %v276_v13  ;;  %v279_v17 = vld [vmem:[#allocation10 + $0x58] sm:$0xff] (!%p684_p4)  ;;  %v280_v19 = vld [vmem:[#allocation10 + $0x60] sm:$0xff] (!%p684_p4)  ;;  %v281_v20 = vld [vmem:[#allocation10 + $0x68] sm:$0xff] (!%p684_p4) }
  0x51   : > { %772 = vmatprep.subr.bf16.mxu0 (!%p684_p4), %v771_v5  ;;  %v787_v18 = vpack.c.bf16 (!%p684_p4), %v279_v17, %v278_v16  ;;  %v791_v21 = vpack.c.bf16 (!%p684_p4), %v281_v20, %v280_v19  ;;  %v282_v22 = vld [vmem:[#allocation10 + $0x70] sm:$0xff] (!%p684_p4)  ;;  %v283_v23 = vld [vmem:[#allocation10 + $0x78] sm:$0xff] (!%p684_p4)  ;;  %v267_v25 = vld [vmem:[#allocation7 + $0x8] sm:$0xff] (!%p684_p4) }
  0x52   : > { %v795_v24 = vpack.c.bf16 (!%p684_p4), %v283_v23, %v282_v22 }
  0x54   : > { %v363_v35 = vld [vmem:[#allocation3] sm:$0x1] }
  0x55   : > { %v440_v39 = vld [vmem:[#allocation4] sm:$0x1] }
  0x58   : > { %774 = vmatpush3.bf16.xpose.msra.mxu0 %v771_v5 }
  0x59   : > { %776 = vmatprep.subr.bf16.mxu0 %v775_v9 }
  0x60   : > { %778 = vmatpush3.bf16.xpose.msra.mxu0 %v775_v9 }
  0x61   : > { %780 = vmatprep.subr.bf16.mxu0 %v779_v12 }
  0x68   : > { %782 = vmatpush3.bf16.xpose.msra.mxu0 %v779_v12 }
  0x69   : > { %784 = vmatprep.subr.bf16.mxu0 %v783_v15 }
  0x70   : > { %786 = vmatpush3.bf16.xpose.msra.mxu0 %v783_v15 }
  0x71   : > { %788 = vmatprep.subr.bf16.mxu0 %v787_v18 }
  0x78   : > { %790 = vmatpush3.bf16.xpose.msra.mxu0 %v787_v18 }
  0x79   : > { %792 = vmatprep.subr.bf16.mxu0 %v791_v21 }
  0x80   : > { %794 = vmatpush3.bf16.xpose.msra.mxu0 %v791_v21 }
  0x81   : > { %796 = vmatprep.subr.bf16.mxu0 %v795_v24 }
  0x88   : > { %798 = vmatpush3.bf16.xpose.msra.mxu0 %v795_v24 }
  0x8f   : > { %751 = vmatmul.mubr.f32.vlgmr.msra.gmra.mrb[0].mxu0 %v267_v25 }
 0x162   : > { %v752_v28 = vpop.f32.mrb[0].mxu0 }
 0x163   : > { %362 = vst [vmem:[#allocation2 + $0x8] sm:$0xff] %v752_v28  ;;  %v442_v29 = vmul.f32 %v752_v28, %v752_v28  ;;  %v350_v30 = vpop.f32.mrb[1].mxu0 }
 0x164   : > { %361 = vst [vmem:[#allocation2] sm:$0xff] %v350_v30  ;;  %v441_v31 = vmul.f32 %v350_v30, %v350_v30  ;;  %v800_v32 = vpack.c.bf16 %v752_v28, %v350_v30 }
 0x166   : > { %v803_v33 = vpack.c.bf16 %v442_v29, %v441_v31  ;;  %801 = vmatpush3.bf16.msra.mxu1 %v800_v32 }
 0x167   : > { %802 = vmatprep.subr.bf16.mxu1 %v996_v26 }
 0x169   : > { %758 = vmatmul.mubr.msk.f32.vlgmr.msra.gmra.mrb[0].mxu1 %vm364_vm1, %v999_v34 }
 0x16a   : > { %804 = vmatpush3.bf16.msra.mxu1 %v803_v33  ;;  %764 = vmatprep.mubr.msk.f32.mxu1 %vm997_vm0, %v998_v27 }
 0x16d   : > { %765 = vmatmul.mubr.msk.f32.vlgmr.msra.gmra.mrb[2].mxu1 %vm364_vm1, %v999_v34 }
 0x23c   : > { %v434_v36 = vpop.f32.mrb[0].mxu1 }
 0x23d   : > { %v438_v37 = vadd.f32 %v434_v36, %v363_v35  ;;  %v759_v38 = vpop.f32.mrb[1].mxu1 }
 0x23f   : > { %439 = vst [vmem:[#allocation3] sm:$0x1] %v438_v37 }
 0x240   : > { %v509_v40 = vpop.f32.mrb[2].mxu1 }
 0x241   : > { %v513_v41 = vadd.f32 %v509_v40, %v440_v39  ;;  %v766_v42 = vpop.f32.mrb[3].mxu1 }
 0x243   : > { %514 = vst [vmem:[#allocation4] sm:$0x1] %v513_v41 }
 0x244 PF: > { %p687_p12 = scmp.ne.s32.totalorder %s982_s15, 1 }
 0x245   : > { %v532_v51 = vld [vmem:[%s1170_s2] sm:$0x1] (!%p687_p12)  ;;  %v542_v58 = vld [vmem:[#allocation2 + $0x8] sm:$0xff] (!%p687_p12) }
 0x246   : > { %518 = sbr.rel (%p687_p12) target bundleno = 625 (0x271), region = 56  ;;  %v523_v43 = vld [vmem:[#allocation3] sm:$0x1] (!%p687_p12)  ;;  %v535_v54 = vld [vmem:[%s1171_s3] sm:$0x1] (!%p687_p12) }
 0x247   : > { %v524_v45 = vmul.f32 (!%p687_p12), 0.0625, %v523_v43  ;;  %v541_v57 = vld [vmem:[#allocation2] sm:$0xff] (!%p687_p12) }
 0x249   : > { %v527_v47 = vmul.f32 (!%p687_p12), %v524_v45, %v524_v45 }
 0x24a   : > { %v525_v44 = vld [vmem:[#allocation4] sm:$0x1] (!%p687_p12) }
 0x24b   : > { %v526_v46 = vmul.f32 (!%p687_p12), 0.0625, %v525_v44 }
 0x24d   : > { %v528_v48 = vsub.f32 %v526_v46, %v527_v47 }
 0x24f   : > { %v529_v49 = vmax.f32 %v528_v48, 0.0 }
 0x251   : > { %v530_v50 = vadd.f32 1e-05, %v529_v49 }
 0x253   : > { %872 = vrsqrt.f32 %v530_v50 }
 0x25d   : > { %v873_v52 = vpop.eup %872 }
 0x25e   : > { %v533_v53 = vmul.f32 %v873_v52, %v532_v51 }
 0x260   : > { %534 = vst [vmem:[#allocation5] sm:$0x1] %v533_v53  ;;  %v536_v55 = vmul.f32 %v533_v53, %v524_v45 }
 0x262   : > { %v537_v56 = vsub.f32 %v535_v54, %v536_v55 }
 0x264   : > { %538 = vst [vmem:[#allocation6] sm:$0x1] %v537_v56 }
 0x267   : > { %v688_v59 = vld [vmem:[#allocation5] ss:$0 sm:$0xff] }
 0x268   : > { %v550_v60 = vmul.f32 %v688_v59, %v541_v57  ;;  %v551_v61 = vmul.f32 %v688_v59, %v542_v58 }
 0x26b   : > { %v689_v62 = vld [vmem:[#allocation6] ss:$0 sm:$0xff] }
 0x26c   : > { %v559_v63 = vadd.f32 %v689_v62, %v550_v60  ;;  %v560_v0 = vadd.f32 %v689_v62, %v551_v61 }
 0x26e   : > { %v561_v1 = vmax.f32 %v559_v63, 0.0  ;;  %v562_v2 = vmax.f32 %v560_v0, 0.0 }
 0x270   : > { %563 = vst [vmem:[#allocation12] sm:$0xff] %v561_v1  ;;  %564 = vst [vmem:[#allocation12 + $0x8] sm:$0xff] %v562_v2 }
 0x271 PF: > { %p1133_p7 = scmp.eq.s32.totalorder %s675_s18, 1  ;;  %s1000_s10 = smov [#allocation12]  }
 0x272   : > { %s580_s11 = sshll.u32 %s1000_s10, 4  ;;  %s581_s11 = int_to_ptr.vmem [resolvable:$true] %s580_s11 }
 0x273   : > { %s930_s12 = scalar_lea.vmem %s581_s11, 256  ;;  %s936_s13 = scalar_lea.vmem %s581_s11, 512 }
 0x274   : > { %p931_p8 = scmp.ne.s32.totalorder %s581_s11, %s930_s12  ;;  %p937_p0 = scmp.lt.s32.totalorder %s581_s11, %s581_s11 }
 0x275   : > { %p938_p1 = scmp.lt.s32.totalorder %s936_s13, %s930_s12 }
 0x276   : > { %p932_p9 = pnand %p931_p8, %p1133_p7 }
 0x277   : > { %p939_p2 = por %p938_p1, %p937_p0 }
 0x278   : > { %p933_p13 = pneg %p932_p9 }
 0x27a   : > { %p940_p5 = pnand %p939_p2, %p933_p13 }
 0x27c   : > { %943 = shalt.err (!%p940_p5)
}
 0x27d   : > { %s944_s23 = scalar_lea.hbm %s1172_s4, 256 }
 0x27e   : > { %p945_p10 = scmp.ne.s32.totalorder %s1172_s4, %s944_s23  ;;  %p950_p6 = scmp.lt.u32.totalorder %s944_s23, %s1172_s4 }
 0x280   : > { %p946_p11 = pnand %p945_p10, %p1133_p7 }
 0x282   : > { %p947_p3 = pneg %p946_p11 }
 0x284   : > { %p952_p4 = pnand %p950_p6, %p947_p3 }
 0x286   : > { %955 = shalt.err (!%p952_p4)
}
 0x287   : > { %s1001_s24 = smov 128   ;;  %s1002_s29 = smov 8  }
 0x288   : > { %814 = dma.vmem_to_hbm [thread:$0]  (%p1133_p7), %s581_s11, 256, %s1172_s4, [#allocation9], %s1001_s24, %s1001_s24, %s1002_s29  }
 0x289 PF: > { %p836_p12 = scmp.eq.s32.totalorder %s676_s19, 1  ;;  %p1185_p8 = scmp.ge.s32.totalorder %s990_s17, 2 }
 0x28b   : > { %p826_p9 = pnand %p836_p12, %p1185_p8 }
 0x28d   : > { %977 = dma.done.wait (!%p826_p9), [#allocation9], 256  }
 0x28e   : > { %979 = vsyncadd (!%p826_p9), [#allocation9], 4294967040  ;;  %s21_s17 = sadd.s32 1, %s990_s17   ;;  %s1186_s15 = smov %s986_s16 }
 0x28f   : > { %p18_p13 = scmp.ge.s32.totalorder %s21_s17, 4   ;;  %s1187_s16 = smov %s1189_s20 }
 0x291   :  { %20 = sbr.rel (!%p18_p13) target bundleno = 6 (0x6), region = 103 }
 0x298   :  { %601 = vsyncpa [#allocation8], 1 }
 0x299   :  { %603 = vsyncpa [#allocation8 + $0x1], 1 }
 0x29a   :  { %604 = vsyncpa [#allocation11], 1 }
 0x29b   :  { %605 = vsyncpa [#allocation9], 1 }
 0x29c   :  { %607 = vsyncpa [#allocation9 + $0x1], 1 }

</bundles_post_ra>
